<compile_context>
chip_gen: v7x
topology: tpu7x:2x2x1
jax: 0.10.0
libtpu: 0.0.40
codegen_flags: <defaults>
</compile_context>

<pallas_src>
import functools

import jax
import jax.numpy as jnp
from jax.experimental import pallas as pl
from jax.experimental.pallas import tpu as pltpu

HIDDEN = 1200
HIDDEN_PAD = 1280  # next multiple of 128


def variation_kernel(x_ref, eps_ref,
                     w1_ref, bn1_ref,          # bn1: row0=gamma1, row1=beta1  (1280 lanes)
                     w2_ref, vz_ref,           # vz:  rows = gamma2, beta2, b_mu, b_logsigma
                     wmu_ref, wls_ref,
                     out_ref):                 # out: [ z | mu | logsigma ] along lanes
    bn_eps = 1e-5
    x = x_ref[...]

    # ---- fc[0..2]: Linear(input_size, 1200[->1280]) -> BatchNorm1d -> LeakyReLU(0.1) ----
    # (Linear bias dropped: cancelled exactly by batch-stat BN mean subtraction.)
    h = jnp.dot(x, w1_ref[...], preferred_element_type=jnp.float32)
    mean1 = jnp.mean(h, axis=0, keepdims=True)
    hc = h - mean1                                   # centered once, reused
    var1 = jnp.mean(hc * hc, axis=0, keepdims=True)  # biased var (training-mode BN)
    h = hc * jax.lax.rsqrt(var1 + bn_eps) * bn1_ref[0:1, :] + bn1_ref[1:2, :]
    h = jnp.where(h > 0, h, 0.1 * h)

    # ---- fc[3]: Dropout(dropout_rate=0.0) -> identity ----
    # TODO(synk): nonzero-rate training dropout would need pltpu.prng_random_bits masking.

    # ---- fc[4..6]: Linear(1200->z_size) -> BatchNorm1d -> LeakyReLU(0.1) ----
    c = jnp.dot(h, w2_ref[...], preferred_element_type=jnp.float32)
    mean2 = jnp.mean(c, axis=0, keepdims=True)
    cc = c - mean2
    var2 = jnp.mean(cc * cc, axis=0, keepdims=True)
    c = cc * jax.lax.rsqrt(var2 + bn_eps) * vz_ref[0:1, :] + vz_ref[1:2, :]
    c = jnp.where(c > 0, c, 0.1 * c)

    # ---- heads + reparameterization ----
    mu = jnp.dot(c, wmu_ref[...], preferred_element_type=jnp.float32) + vz_ref[2:3, :]
    logsigma = jnp.dot(c, wls_ref[...], preferred_element_type=jnp.float32) + vz_ref[3:4, :]
    std = jnp.exp(0.5 * logsigma)
    z = eps_ref[...] * std + mu

    # Single lane-packed output slab: one store, one writeback DMA.
    out_ref[...] = jnp.concatenate([z, mu, logsigma], axis=-1)


def variation_forward(context, epsilon, packed):
    """Runs the Variation forward pass in one Pallas call.

    context: (B, input_size) f32, epsilon: (B, z_size) f32.
    packed:  dict from pack_params().
    Returns (z, mu, logsigma), each (B, z_size) f32.
    """
    B, _ = context.shape
    z_size = packed["wmu"].shape[1]

    inputs = (
        context, epsilon,
        packed["w1"], packed["bn1"],
        packed["w2"], packed["vz"],
        packed["wmu"], packed["wls"],
    )

    vmem_spec = pl.BlockSpec(memory_space=pltpu.MemorySpace.VMEM)
    out = pl.pallas_call(
        variation_kernel,
        out_shape=jax.ShapeDtypeStruct((B, 3 * z_size), jnp.float32),
        in_specs=[vmem_spec] * len(inputs),
        out_specs=vmem_spec,
    )(*inputs)

    z = out[:, :z_size]
    mu = out[:, z_size:2 * z_size]
    logsigma = out[:, 2 * z_size:]
    return z, mu, logsigma


def init_params(key, input_size, z_size, init_w):
    """Deterministic param init matching Variation.__init__ / init_weights.

    Returns unpadded, PyTorch-equivalent parameters (weights stored transposed
    as (in_features, out_features)).
    """
    ks = jax.random.split(key, 4)

    def lin(k, fan_in, fan_out):
        # PyTorch Linear weight is (out, in); we store the transpose (in, out).
        w = jax.random.uniform(k, (fan_in, fan_out), jnp.float32,
                               minval=-init_w, maxval=init_w)
        b = jnp.zeros((1, fan_out), jnp.float32)
        return w, b

    w1, b1 = lin(ks[0], input_size, HIDDEN)
    w2, b2 = lin(ks[1], HIDDEN, z_size)
    wmu, bmu = lin(ks[2], z_size, z_size)
    wls, bls = lin(ks[3], z_size, z_size)

    return {
        "w1": w1, "b1": b1,
        "g1": jnp.ones((1, HIDDEN), jnp.float32), "be1": jnp.zeros((1, HIDDEN), jnp.float32),
        "w2": w2, "b2": b2,
        "g2": jnp.ones((1, z_size), jnp.float32), "be2": jnp.zeros((1, z_size), jnp.float32),
        "wmu": wmu, "bmu": bmu,
        "wls": wls, "bls": bls,
    }


def pack_params(params):
    """One-time repack for the kernel: pad hidden 1200->1280 and fuse small vectors.

    Padding is with zeros, so results are bit-for-bit-equivalent math:
      - padded h columns are 0, BN maps them to 0 (gamma/beta padded with 0),
        LeakyReLU(0)=0, and padded w2 rows are 0 so they contribute nothing.
    Linear biases b1/b2 are dropped entirely (cancelled by batch-stat BN).
    """
    pad = HIDDEN_PAD - HIDDEN
    w1p = jnp.pad(params["w1"], ((0, 0), (0, pad)))          # (in, 1280)
    w2p = jnp.pad(params["w2"], ((0, pad), (0, 0)))          # (1280, z)
    g1p = jnp.pad(params["g1"], ((0, 0), (0, pad)))
    be1p = jnp.pad(params["be1"], ((0, 0), (0, pad)))
    bn1 = jnp.concatenate([g1p, be1p], axis=0)               # (2, 1280)
    vz = jnp.concatenate([params["g2"], params["be2"],
                          params["bmu"], params["bls"]], axis=0)  # (4, z)
    return {
        "w1": w1p, "bn1": bn1,
        "w2": w2p, "vz": vz,
        "wmu": params["wmu"], "wls": params["wls"],
    }


def reference_forward(context, epsilon, params):
    """Pure-JAX reference (same math as the PyTorch module) for correctness."""
    bn_eps = 1e-5

    def bn_lrelu(h, g, be):
        m = jnp.mean(h, axis=0, keepdims=True)
        v = jnp.mean((h - m) ** 2, axis=0, keepdims=True)
        h = (h - m) / jnp.sqrt(v + bn_eps) * g + be
        return jnp.where(h > 0, h, 0.1 * h)

    h = bn_lrelu(context @ params["w1"] + params["b1"], params["g1"], params["be1"])
    c = bn_lrelu(h @ params["w2"] + params["b2"], params["g2"], params["be2"])
    mu = c @ params["wmu"] + params["bmu"]
    logsigma = c @ params["wls"] + params["bls"]
    z = epsilon * jnp.exp(0.5 * logsigma) + mu
    return z, mu, logsigma


if __name__ == "__main__":
    input_size = 32
    z_size = 16
    batch = 8
    dropout_rate = 0.0   # identity dropout (deterministic)
    init_weight = 0.02

    key = jax.random.PRNGKey(0)
    k_params, k_ctx, k_eps = jax.random.split(key, 3)

    params = init_params(k_params, input_size, z_size, init_weight)
    packed = jax.tree_util.tree_map(jax.device_put, pack_params(params))  # packed once, outside jit
    context = jax.random.normal(k_ctx, (batch, input_size), jnp.float32)
    epsilon = jax.random.normal(k_eps, (batch, z_size), jnp.float32)

    fwd = jax.jit(functools.partial(variation_forward))
    z, mu, logsigma = fwd(context, epsilon, packed)
    jax.block_until_ready((z, mu, logsigma))

    z_r, mu_r, ls_r = reference_forward(context, epsilon, params)
    assert jnp.allclose(z, z_r, atol=1e-4, rtol=1e-4)
    assert jnp.allclose(mu, mu_r, atol=1e-4, rtol=1e-4)
    assert jnp.allclose(logsigma, ls_r, atol=1e-4, rtol=1e-4)

    print("KERNEL_OK")
</pallas_src>

<mosaic_0001>
module attributes {stable_mosaic.version = 11 : i64} {
  func.func @variation_kernel(%arg0: memref<8x32xf32, #tpu.memory_space<vmem>>, %arg1: memref<8x16xf32, #tpu.memory_space<vmem>>, %arg2: memref<32x1280xf32, #tpu.memory_space<vmem>>, %arg3: memref<2x1280xf32, #tpu.memory_space<vmem>>, %arg4: memref<1280x16xf32, #tpu.memory_space<vmem>>, %arg5: memref<4x16xf32, #tpu.memory_space<vmem>>, %arg6: memref<16x16xf32, #tpu.memory_space<vmem>>, %arg7: memref<16x16xf32, #tpu.memory_space<vmem>>, %arg8: memref<8x48xf32, #tpu.memory_space<vmem>>) attributes {dimension_semantics = [], scalar_prefetch = 0 : i64, scratch_operands = 0 : i64, tpu.core_type = #tpu.core_type<tc>} {
    %c0 = arith.constant 0 : index
    %c0_0 = arith.constant 0 : index
    %0 = vector.load %arg0[%c0, %c0_0] : memref<8x32xf32, #tpu.memory_space<vmem>>, vector<8x32xf32>
    %c0_1 = arith.constant 0 : index
    %c0_2 = arith.constant 0 : index
    %1 = vector.load %arg2[%c0_1, %c0_2] : memref<32x1280xf32, #tpu.memory_space<vmem>>, vector<32x1280xf32>
    %cst = arith.constant dense<0.000000e+00> : vector<8x1280xf32>
    %2 = tpu.matmul %0, %1, %cst {dimension_numbers = #tpu.dot_dimension_numbers<[1], [0], [0], [1], [0, 0, 1, 1], [], []>} : vector<8x32xf32>, vector<32x1280xf32>, vector<8x1280xf32> -> vector<8x1280xf32>
    %cst_3 = arith.constant dense<0.000000e+00> : vector<1280xf32>
    %3 = vector.multi_reduction <add>, %2, %cst_3 [0] : vector<8x1280xf32> to vector<1280xf32>
    %4 = vector.shape_cast %3 : vector<1280xf32> to vector<1x1280xf32>
    %cst_4 = arith.constant 8.000000e+00 : f32
    %5 = vector.broadcast %cst_4 : f32 to vector<1x1280xf32>
    %6 = arith.divf %4, %5 : vector<1x1280xf32>
    %7 = vector.broadcast %6 : vector<1x1280xf32> to vector<8x1280xf32>
    %8 = arith.subf %2, %7 : vector<8x1280xf32>
    %9 = arith.mulf %8, %8 : vector<8x1280xf32>
    %cst_5 = arith.constant dense<0.000000e+00> : vector<1280xf32>
    %10 = vector.multi_reduction <add>, %9, %cst_5 [0] : vector<8x1280xf32> to vector<1280xf32>
    %11 = vector.shape_cast %10 : vector<1280xf32> to vector<1x1280xf32>
    %cst_6 = arith.constant 8.000000e+00 : f32
    %12 = vector.broadcast %cst_6 : f32 to vector<1x1280xf32>
    %13 = arith.divf %11, %12 : vector<1x1280xf32>
    %cst_7 = arith.constant 9.99999974E-6 : f32
    %14 = vector.broadcast %cst_7 : f32 to vector<1x1280xf32>
    %15 = arith.addf %13, %14 : vector<1x1280xf32>
    %16 = math.rsqrt %15 : vector<1x1280xf32>
    %17 = vector.broadcast %16 : vector<1x1280xf32> to vector<8x1280xf32>
    %18 = arith.mulf %8, %17 : vector<8x1280xf32>
    %c0_8 = arith.constant 0 : index
    %c0_9 = arith.constant 0 : index
    %19 = vector.load %arg3[%c0_8, %c0_9] : memref<2x1280xf32, #tpu.memory_space<vmem>>, vector<1x1280xf32>
    %20 = vector.broadcast %19 : vector<1x1280xf32> to vector<8x1280xf32>
    %21 = arith.mulf %18, %20 : vector<8x1280xf32>
    %c1 = arith.constant 1 : index
    %c0_10 = arith.constant 0 : index
    %22 = vector.load %arg3[%c1, %c0_10] : memref<2x1280xf32, #tpu.memory_space<vmem>>, vector<1x1280xf32>
    %23 = vector.broadcast %22 : vector<1x1280xf32> to vector<8x1280xf32>
    %24 = arith.addf %21, %23 : vector<8x1280xf32>
    %cst_11 = arith.constant 0.000000e+00 : f32
    %25 = vector.broadcast %cst_11 : f32 to vector<8x1280xf32>
    %26 = arith.cmpf ogt, %24, %25 : vector<8x1280xf32>
    %cst_12 = arith.constant 1.000000e-01 : f32
    %27 = vector.broadcast %cst_12 : f32 to vector<8x1280xf32>
    %28 = arith.mulf %27, %24 : vector<8x1280xf32>
    %29 = arith.select %26, %24, %28 : vector<8x1280xi1>, vector<8x1280xf32>
    %c0_13 = arith.constant 0 : index
    %c0_14 = arith.constant 0 : index
    %30 = vector.load %arg4[%c0_13, %c0_14] : memref<1280x16xf32, #tpu.memory_space<vmem>>, vector<1280x16xf32>
    %cst_15 = arith.constant dense<0.000000e+00> : vector<8x16xf32>
    %31 = tpu.matmul %29, %30, %cst_15 {dimension_numbers = #tpu.dot_dimension_numbers<[1], [0], [0], [1], [0, 0, 1, 1], [], []>} : vector<8x1280xf32>, vector<1280x16xf32>, vector<8x16xf32> -> vector<8x16xf32>
    %cst_16 = arith.constant dense<0.000000e+00> : vector<16xf32>
    %32 = vector.multi_reduction <add>, %31, %cst_16 [0] : vector<8x16xf32> to vector<16xf32>
    %33 = vector.shape_cast %32 : vector<16xf32> to vector<1x16xf32>
    %cst_17 = arith.constant 8.000000e+00 : f32
    %34 = vector.broadcast %cst_17 : f32 to vector<1x16xf32>
    %35 = arith.divf %33, %34 : vector<1x16xf32>
    %36 = vector.broadcast %35 : vector<1x16xf32> to vector<8x16xf32>
    %37 = arith.subf %31, %36 : vector<8x16xf32>
    %38 = arith.mulf %37, %37 : vector<8x16xf32>
    %cst_18 = arith.constant dense<0.000000e+00> : vector<16xf32>
    %39 = vector.multi_reduction <add>, %38, %cst_18 [0] : vector<8x16xf32> to vector<16xf32>
    %40 = vector.shape_cast %39 : vector<16xf32> to vector<1x16xf32>
    %cst_19 = arith.constant 8.000000e+00 : f32
    %41 = vector.broadcast %cst_19 : f32 to vector<1x16xf32>
    %42 = arith.divf %40, %41 : vector<1x16xf32>
    %cst_20 = arith.constant 9.99999974E-6 : f32
    %43 = vector.broadcast %cst_20 : f32 to vector<1x16xf32>
    %44 = arith.addf %42, %43 : vector<1x16xf32>
    %45 = math.rsqrt %44 : vector<1x16xf32>
    %46 = vector.broadcast %45 : vector<1x16xf32> to vector<8x16xf32>
    %47 = arith.mulf %37, %46 : vector<8x16xf32>
    %c0_21 = arith.constant 0 : index
    %c0_22 = arith.constant 0 : index
    %48 = vector.load %arg5[%c0_21, %c0_22] : memref<4x16xf32, #tpu.memory_space<vmem>>, vector<1x16xf32>
    %49 = vector.broadcast %48 : vector<1x16xf32> to vector<8x16xf32>
    %50 = arith.mulf %47, %49 : vector<8x16xf32>
    %c1_23 = arith.constant 1 : index
    %c0_24 = arith.constant 0 : index
    %51 = vector.load %arg5[%c1_23, %c0_24] : memref<4x16xf32, #tpu.memory_space<vmem>>, vector<1x16xf32>
    %52 = vector.broadcast %51 : vector<1x16xf32> to vector<8x16xf32>
    %53 = arith.addf %50, %52 : vector<8x16xf32>
    %cst_25 = arith.constant 0.000000e+00 : f32
    %54 = vector.broadcast %cst_25 : f32 to vector<8x16xf32>
    %55 = arith.cmpf ogt, %53, %54 : vector<8x16xf32>
    %cst_26 = arith.constant 1.000000e-01 : f32
    %56 = vector.broadcast %cst_26 : f32 to vector<8x16xf32>
    %57 = arith.mulf %56, %53 : vector<8x16xf32>
    %58 = arith.select %55, %53, %57 : vector<8x16xi1>, vector<8x16xf32>
    %c0_27 = arith.constant 0 : index
    %c0_28 = arith.constant 0 : index
    %59 = vector.load %arg6[%c0_27, %c0_28] : memref<16x16xf32, #tpu.memory_space<vmem>>, vector<16x16xf32>
    %cst_29 = arith.constant dense<0.000000e+00> : vector<8x16xf32>
    %60 = tpu.matmul %58, %59, %cst_29 {dimension_numbers = #tpu.dot_dimension_numbers<[1], [0], [0], [1], [0, 0, 1, 1], [], []>} : vector<8x16xf32>, vector<16x16xf32>, vector<8x16xf32> -> vector<8x16xf32>
    %c2 = arith.constant 2 : index
    %c0_30 = arith.constant 0 : index
    %61 = vector.load %arg5[%c2, %c0_30] : memref<4x16xf32, #tpu.memory_space<vmem>>, vector<1x16xf32>
    %62 = vector.broadcast %61 : vector<1x16xf32> to vector<8x16xf32>
    %63 = arith.addf %60, %62 : vector<8x16xf32>
    %c0_31 = arith.constant 0 : index
    %c0_32 = arith.constant 0 : index
    %64 = vector.load %arg7[%c0_31, %c0_32] : memref<16x16xf32, #tpu.memory_space<vmem>>, vector<16x16xf32>
    %cst_33 = arith.constant dense<0.000000e+00> : vector<8x16xf32>
    %65 = tpu.matmul %58, %64, %cst_33 {dimension_numbers = #tpu.dot_dimension_numbers<[1], [0], [0], [1], [0, 0, 1, 1], [], []>} : vector<8x16xf32>, vector<16x16xf32>, vector<8x16xf32> -> vector<8x16xf32>
    %c3 = arith.constant 3 : index
    %c0_34 = arith.constant 0 : index
    %66 = vector.load %arg5[%c3, %c0_34] : memref<4x16xf32, #tpu.memory_space<vmem>>, vector<1x16xf32>
    %67 = vector.broadcast %66 : vector<1x16xf32> to vector<8x16xf32>
    %68 = arith.addf %65, %67 : vector<8x16xf32>
    %cst_35 = arith.constant 5.000000e-01 : f32
    %69 = vector.broadcast %cst_35 : f32 to vector<8x16xf32>
    %70 = arith.mulf %69, %68 : vector<8x16xf32>
    %71 = math.exp %70 : vector<8x16xf32>
    %c0_36 = arith.constant 0 : index
    %c0_37 = arith.constant 0 : index
    %72 = vector.load %arg1[%c0_36, %c0_37] : memref<8x16xf32, #tpu.memory_space<vmem>>, vector<8x16xf32>
    %73 = arith.mulf %72, %71 : vector<8x16xf32>
    %74 = arith.addf %73, %63 : vector<8x16xf32>
    %75 = tpu.concatenate %74, %63, %68 in 1 : vector<8x16xf32>, vector<8x16xf32>, vector<8x16xf32> -> vector<8x48xf32>
    %c0_38 = arith.constant 0 : index
    %c0_39 = arith.constant 0 : index
    %76 = vector.load %arg8[%c0_38, %c0_39] : memref<8x48xf32, #tpu.memory_space<vmem>>, vector<8x48xf32>
    tpu.vector_store %arg8[%c0_38, %c0_39], %75 {strides = array<i32>} : memref<8x48xf32, #tpu.memory_space<vmem>>, vector<8x48xf32>,
    return
  }
}

</mosaic_0001>

<bundles_post_ra>
// kernel: variation_forward.1
= control target key start
LH: loop header
LB: loop body
LE: loop exit
PB: predicated region body
PF: predicated region fallthrough
CT: control target
= control target key end

     0   :  { %v1951_v3 = vmov 0.0   ;;  %vm70_vm0 = vcmask 261120   ;;  %vm1953_vm11 = vmmov 0   ;;  %vm1291_vm12 = vcmask 130048   ;;  %s1954_s20 = smov 16   ;;  %s1955_s21 = smov 32   ;;  %s2828_s2 = inlined_call_operand.vmem [shape: f32[32,1280], index: 2, kind: input, shape index: {}]   ;;  %s2829_s0 = inlined_call_operand.vmem [shape: f32[8,32], index: 0, kind: input, shape index: {}]   ;;  %s2830_s4 = inlined_call_operand.vmem [shape: f32[1280,16], index: 4, kind: input, shape index: {}]   ;;  %s2831_s3 = inlined_call_operand.vmem [shape: f32[2,1280], index: 3, kind: input, shape index: {}]   ;;  %s2832_s6 = inlined_call_operand.vmem [shape: f32[16,16], index: 6, kind: input, shape index: {}]   ;;  %s2833_s5 = inlined_call_operand.vmem [shape: f32[4,16], index: 5, kind: input, shape index: {}]   ;;  %s2834_s7 = inlined_call_operand.vmem [shape: f32[16,16], index: 7, kind: input, shape index: {}]   ;;  %s2835_s1 = inlined_call_operand.vmem [shape: f32[8,16], index: 1, kind: input, shape index: {}]   ;;  %s2836_s8 = inlined_call_operand.vmem [shape: f32[8,48], index: 8, kind: output, shape index: {}]  }
   0x1   :  { %v31_v0 = vld [vmem:[%s2828_s2 + $0x8] sm:$0xff]  ;;  %v41_v1 = vld [vmem:[%s2828_s2 + $0x58] sm:$0xff]  ;;  %v30_v2 = vld [vmem:[%s2828_s2] sm:$0xff]  ;;  %138 = vmatprep.mubr.f32.mxu0 %v1951_v3  ;;  %351 = vmatprep.mubr.f32.mxu1 %v1951_v3  ;;  %vm1501_vm14 = vcmask 392192  }
   0x2   :  { %v1716_v4 = vpack.c.bf16 %v41_v1, %v31_v0  ;;  %v40_v5 = vld [vmem:[%s2828_s2 + $0x50] sm:$0xff]  ;;  %v51_v6 = vld [vmem:[%s2828_s2 + $0xa8] sm:$0xff]  ;;  %v61_v7 = vld [vmem:[%s2828_s2 + $0xf8] sm:$0xff] }
   0x3   :  { %v1718_v8 = vpack.c.bf16 %v40_v5, %v30_v2  ;;  %v1720_v9 = vpack.c.bf16 %v61_v7, %v51_v6  ;;  %v50_v10 = vld [vmem:[%s2828_s2 + $0xa0] sm:$0xff]  ;;  %v60_v11 = vld [vmem:[%s2828_s2 + $0xf0] sm:$0xff]  ;;  %v33_v12 = vld [vmem:[%s2828_s2 + $0x18] sm:$0xff] }
   0x4   :  { %1717 = vmatprep.subr.bf16.mxu0 %v1716_v4  ;;  %v43_v13 = vld [vmem:[%s2828_s2 + $0x68] sm:$0xff]  ;;  %v1722_v14 = vpack.c.bf16 %v60_v11, %v50_v10  ;;  %v32_v16 = vld [vmem:[%s2828_s2 + $0x10] sm:$0xff]  ;;  %v42_v17 = vld [vmem:[%s2828_s2 + $0x60] sm:$0xff] }
   0x5   :  { %1719 = vmatpush1.bf16.msra.mxu0 %v1718_v8  ;;  %v1724_v15 = vpack.c.bf16 %v43_v13, %v33_v12  ;;  %v37_v18 = vld [vmem:[%s2828_s2 + $0x38] sm:$0xff]  ;;  %v63_v20 = vld [vmem:[%s2828_s2 + $0x108] sm:$0xff]  ;;  %v36_v23 = vld [vmem:[%s2828_s2 + $0x30] sm:$0xff]  ;;  %v1726_v26 = vpack.c.bf16 %v42_v17, %v32_v16 }
   0x6   :  { %1721 = vmatprep.subr.bf16.mxu0 %v1720_v9  ;;  %v53_v19 = vld [vmem:[%s2828_s2 + $0xb8] sm:$0xff]  ;;  %v47_v21 = vld [vmem:[%s2828_s2 + $0x88] sm:$0xff]  ;;  %v46_v24 = vld [vmem:[%s2828_s2 + $0x80] sm:$0xff] }
   0x7   :  { %v1740_v22 = vpack.c.bf16 %v47_v21, %v37_v18  ;;  %v29_v25 = vld [vmem:[%s2829_s0] sm:$0xff]  ;;  %v1742_v27 = vpack.c.bf16 %v46_v24, %v36_v23  ;;  %v57_v28 = vld [vmem:[%s2828_s2 + $0xd8] sm:$0xff]  ;;  %v67_v29 = vld [vmem:[%s2828_s2 + $0x128] sm:$0xff]  ;;  %v1728_v30 = vpack.c.bf16 %v63_v20, %v53_v19 }
   0x8   :  { %v52_v31 = vld [vmem:[%s2828_s2 + $0xb0] sm:$0xff]  ;;  %v62_v32 = vld [vmem:[%s2828_s2 + $0x100] sm:$0xff]  ;;  %v1744_v33 = vpack.c.bf16 %v67_v29, %v57_v28  ;;  %v35_v35 = vld [vmem:[%s2828_s2 + $0x28] sm:$0xff] }
   0x9   :  { %1723 = vmatpush1.bf16.msra.mxu0 %v1722_v14  ;;  %1741 = vmatprep.subr.bf16.mxu1 %v1740_v22  ;;  %v56_v34 = vld [vmem:[%s2828_s2 + $0xd0] sm:$0xff]  ;;  %v45_v36 = vld [vmem:[%s2828_s2 + $0x78] sm:$0xff]  ;;  %v66_v37 = vld [vmem:[%s2828_s2 + $0x120] sm:$0xff]  ;;  %v1730_v39 = vpack.c.bf16 %v62_v32, %v52_v31 }
   0xa   :  { %1725 = vmatprep.subr.bf16.mxu0 %v1724_v15  ;;  %1743 = vmatpush1.bf16.msra.mxu1 %v1742_v27  ;;  %v1746_v38 = vpack.c.bf16 %v66_v37, %v56_v34  ;;  %v1732_v40 = vpack.c.bf16 %v45_v36, %v35_v35  ;;  %v34_v41 = vld [vmem:[%s2828_s2 + $0x20] sm:$0xff]  ;;  %v44_v42 = vld [vmem:[%s2828_s2 + $0x70] sm:$0xff]  ;;  %v55_v43 = vld [vmem:[%s2828_s2 + $0xc8] sm:$0xff] }
   0xb   :  { %1745 = vmatprep.subr.bf16.mxu1 %v1744_v33  ;;  %v65_v44 = vld [vmem:[%s2828_s2 + $0x118] sm:$0xff]  ;;  %v1734_v45 = vpack.c.bf16 %v44_v42, %v34_v41  ;;  %v54_v47 = vld [vmem:[%s2828_s2 + $0xc0] sm:$0xff]  ;;  %v64_v48 = vld [vmem:[%s2828_s2 + $0x110] sm:$0xff] }
   0xc   :  { %1507 = vmatmul.mubr.msk.f32.vlgmr.msra.gmra.mrb[0].mxu0 %vm70_vm0, %v29_v25  ;;  %v1736_v46 = vpack.c.bf16 %v65_v44, %v55_v43  ;;  %v39_v49 = vld [vmem:[%s2828_s2 + $0x48] sm:$0xff]  ;;  %v49_v50 = vld [vmem:[%s2828_s2 + $0x98] sm:$0xff]  ;;  %v1738_v51 = vpack.c.bf16 %v64_v48, %v54_v47  ;;  %v38_v53 = vld [vmem:[%s2828_s2 + $0x40] sm:$0xff] }
   0xd   :  { %1727 = vmatpush1.bf16.msra.mxu0 %v1726_v26  ;;  %209 = vmatprep.mubr.f32.mxu0 %v1951_v3  ;;  %v1748_v52 = vpack.c.bf16 %v49_v50, %v39_v49  ;;  %v48_v54 = vld [vmem:[%s2828_s2 + $0x90] sm:$0xff]  ;;  %v59_v55 = vld [vmem:[%s2828_s2 + $0xe8] sm:$0xff]  ;;  %v69_v56 = vld [vmem:[%s2828_s2 + $0x138] sm:$0xff] }
   0xe   :  { %1729 = vmatprep.subr.bf16.mxu0 %v1728_v30  ;;  %1747 = vmatpush1.bf16.msra.mxu1 %v1746_v38  ;;  %v1750_v57 = vpack.c.bf16 %v48_v54, %v38_v53  ;;  %v1752_v58 = vpack.c.bf16 %v69_v56, %v59_v55  ;;  %v58_v59 = vld [vmem:[%s2828_s2 + $0xe0] sm:$0xff]  ;;  %v68_v60 = vld [vmem:[%s2828_s2 + $0x130] sm:$0xff]  ;;  %v798_v63 = vld [vmem:[%s2830_s4 + $0x88] sm:$0xff] }
   0xf   :  { %v1754_v61 = vpack.c.bf16 %v68_v60, %v58_v59  ;;  %v797_v62 = vld [vmem:[%s2830_s4 + $0x80] sm:$0xff]  ;;  %v782_v2 = vld [vmem:[%s2830_s4 + $0x8] sm:$0xff]  ;;  %v799_v5 = vld [vmem:[%s2830_s4 + $0x90] sm:$0xff] }
  0x10   :  { %v1756_v0 = vpack.c.bf16 %v798_v63, %v797_v62  ;;  %v781_v1 = vld [vmem:[%s2830_s4] sm:$0xff]  ;;  %v800_v6 = vld [vmem:[%s2830_s4 + $0x98] sm:$0xff]  ;;  %v783_v8 = vld [vmem:[%s2830_s4 + $0x10] sm:$0xff] }
  0x11   :  { %1731 = vmatpush1.bf16.msra.mxu0 %v1730_v39  ;;  %1510 = vmatmul.mubr.msk.f32.vlgmr.msra.gmra.mrb[0].mxu1 %vm70_vm0, %v29_v25  ;;  %v1758_v4 = vpack.c.bf16 %v782_v2, %v781_v1  ;;  %v1760_v7 = vpack.c.bf16 %v800_v6, %v799_v5  ;;  %v784_v9 = vld [vmem:[%s2830_s4 + $0x18] sm:$0xff]  ;;  %v801_v11 = vld [vmem:[%s2830_s4 + $0xa0] sm:$0xff]  ;;  %v802_v12 = vld [vmem:[%s2830_s4 + $0xa8] sm:$0xff] }
  0x12   :  { %1733 = vmatprep.subr.bf16.mxu0 %v1732_v40  ;;  %1757 = vmatprep.subr.bf16.mxu1 %v1756_v0  ;;  %v1762_v10 = vpack.c.bf16 %v784_v9, %v783_v8  ;;  %v829_v13 = vld [vmem:[%s2830_s4 + $0x180] sm:$0xff]  ;;  %v1764_v14 = vpack.c.bf16 %v802_v12, %v801_v11  ;;  %v830_v15 = vld [vmem:[%s2830_s4 + $0x188] sm:$0xff]  ;;  %v803_v23 = vld [vmem:[%s2830_s4 + $0xb0] sm:$0xff] }
  0x13   :  { %1759 = vmatpush3.bf16.msra.mxu1 %v1758_v4  ;;  %v785_v16 = vld [vmem:[%s2830_s4 + $0x20] sm:$0xff]  ;;  %v786_v17 = vld [vmem:[%s2830_s4 + $0x28] sm:$0xff]  ;;  %v1788_v18 = vpack.c.bf16 %v830_v15, %v829_v13  ;;  %v804_v24 = vld [vmem:[%s2830_s4 + $0xb8] sm:$0xff] }
  0x14   :  { %1508 = vmatmul.mubr.msk.f32.vlgmr.msra.gmra.mrb[2].mxu0 %vm70_vm0, %v29_v25  ;;  %1761 = vmatprep.subr.bf16.mxu1 %v1760_v7  ;;  %v1766_v19 = vpack.c.bf16 %v786_v17, %v785_v16  ;;  %v813_v20 = vld [vmem:[%s2830_s4 + $0x100] sm:$0xff]  ;;  %v814_v21 = vld [vmem:[%s2830_s4 + $0x108] sm:$0xff]  ;;  %v831_v26 = vld [vmem:[%s2830_s4 + $0x190] sm:$0xff] }
  0x15   :  { %1735 = vmatpush1.bf16.msra.mxu0 %v1734_v45  ;;  %280 = vmatprep.mubr.f32.mxu0 %v1951_v3  ;;  %v1790_v22 = vpack.c.bf16 %v814_v21, %v813_v20  ;;  %v832_v27 = vld [vmem:[%s2830_s4 + $0x198] sm:$0xff]  ;;  %v787_v28 = vld [vmem:[%s2830_s4 + $0x30] sm:$0xff]  ;;  %v805_v35 = vld [vmem:[%s2830_s4 + $0xc0] sm:$0xff] }
  0x16   :  { %1737 = vmatprep.subr.bf16.mxu0 %v1736_v46  ;;  %v1792_v29 = vpack.c.bf16 %v832_v27, %v831_v26  ;;  %v788_v30 = vld [vmem:[%s2830_s4 + $0x38] sm:$0xff]  ;;  %v815_v31 = vld [vmem:[%s2830_s4 + $0x110] sm:$0xff]  ;;  %v806_v36 = vld [vmem:[%s2830_s4 + $0xc8] sm:$0xff] }
  0x17   :  { %1763 = vmatpush3.bf16.msra.mxu1 %v1762_v10  ;;  %v816_v32 = vld [vmem:[%s2830_s4 + $0x118] sm:$0xff]  ;;  %v1770_v33 = vpack.c.bf16 %v788_v30, %v787_v28  ;;  %v833_v37 = vld [vmem:[%s2830_s4 + $0x1a0] sm:$0xff]  ;;  %v1772_v38 = vpack.c.bf16 %v806_v36, %v805_v35  ;;  %v834_v39 = vld [vmem:[%s2830_s4 + $0x1a8] sm:$0xff] }
  0x18   :  { %1765 = vmatprep.subr.bf16.mxu1 %v1764_v14  ;;  %v1794_v34 = vpack.c.bf16 %v816_v32, %v815_v31  ;;  %v789_v40 = vld [vmem:[%s2830_s4 + $0x40] sm:$0xff]  ;;  %v790_v41 = vld [vmem:[%s2830_s4 + $0x48] sm:$0xff]  ;;  %v1796_v42 = vpack.c.bf16 %v834_v39, %v833_v37  ;;  %v807_v47 = vld [vmem:[%s2830_s4 + $0xd0] sm:$0xff] }
  0x19   :  { %1739 = vmatpush1.bf16.msra.mxu0 %v1738_v51  ;;  %v1774_v43 = vpack.c.bf16 %v790_v41, %v789_v40  ;;  %v817_v44 = vld [vmem:[%s2830_s4 + $0x120] sm:$0xff]  ;;  %v818_v45 = vld [vmem:[%s2830_s4 + $0x128] sm:$0xff]  ;;  %v808_v48 = vld [vmem:[%s2830_s4 + $0xd8] sm:$0xff] }
  0x1a   :  { %1749 = vmatprep.subr.bf16.mxu0 %v1748_v52  ;;  %v1798_v46 = vpack.c.bf16 %v818_v45, %v817_v44  ;;  %v835_v49 = vld [vmem:[%s2830_s4 + $0x1b0] sm:$0xff]  ;;  %v1776_v50 = vpack.c.bf16 %v808_v48, %v807_v47  ;;  %v836_v51 = vld [vmem:[%s2830_s4 + $0x1b8] sm:$0xff]  ;;  %v809_v59 = vld [vmem:[%s2830_s4 + $0xe0] sm:$0xff] }
  0x1b   :  { %1767 = vmatpush3.bf16.msra.mxu1 %v1766_v19  ;;  %v791_v52 = vld [vmem:[%s2830_s4 + $0x50] sm:$0xff]  ;;  %v792_v53 = vld [vmem:[%s2830_s4 + $0x58] sm:$0xff]  ;;  %v1800_v54 = vpack.c.bf16 %v836_v51, %v835_v49  ;;  %v810_v60 = vld [vmem:[%s2830_s4 + $0xe8] sm:$0xff] }
  0x1c   :  { %1509 = vmatmul.mubr.msk.f32.vlgmr.msra.gmra.mrb[4].mxu0 %vm70_vm0, %v29_v25  ;;  %v1778_v55 = vpack.c.bf16 %v792_v53, %v791_v52  ;;  %v819_v56 = vld [vmem:[%s2830_s4 + $0x130] sm:$0xff]  ;;  %v1780_v62 = vpack.c.bf16 %v810_v60, %v809_v59  ;;  %v838_v63 = vld [vmem:[%s2830_s4 + $0x1c8] sm:$0xff]  ;;  %v793_v0 = vld [vmem:[%s2830_s4 + $0x60] sm:$0xff] }
  0x1d   :  { %1751 = vmatpush1.bf16.msra.mxu0 %v1750_v57  ;;  %422 = vmatprep.mubr.f32.mxu0 %v1951_v3  ;;  %v820_v57 = vld [vmem:[%s2830_s4 + $0x138] sm:$0xff]  ;;  %v794_v1 = vld [vmem:[%s2830_s4 + $0x68] sm:$0xff]  ;;  %v821_v5 = vld [vmem:[%s2830_s4 + $0x140] sm:$0xff] }
  0x1e   :  { %1753 = vmatprep.subr.bf16.mxu0 %v1752_v58  ;;  %v1802_v58 = vpack.c.bf16 %v820_v57, %v819_v56  ;;  %v1782_v4 = vpack.c.bf16 %v794_v1, %v793_v0  ;;  %v822_v6 = vld [vmem:[%s2830_s4 + $0x148] sm:$0xff]  ;;  %v811_v8 = vld [vmem:[%s2830_s4 + $0xf0] sm:$0xff]  ;;  %v812_v9 = vld [vmem:[%s2830_s4 + $0xf8] sm:$0xff] }
  0x1f   :  { %v1806_v7 = vpack.c.bf16 %v822_v6, %v821_v5  ;;  %v839_v10 = vld [vmem:[%s2830_s4 + $0x1d0] sm:$0xff]  ;;  %v1784_v11 = vpack.c.bf16 %v812_v9, %v811_v8  ;;  %v840_v12 = vld [vmem:[%s2830_s4 + $0x1d8] sm:$0xff]  ;;  %v841_v20 = vld [vmem:[%s2830_s4 + $0x1e0] sm:$0xff] }
  0x20   :  { %v795_v13 = vld [vmem:[%s2830_s4 + $0x70] sm:$0xff]  ;;  %v796_v14 = vld [vmem:[%s2830_s4 + $0x78] sm:$0xff]  ;;  %v1808_v15 = vpack.c.bf16 %v840_v12, %v839_v10  ;;  %v842_v21 = vld [vmem:[%s2830_s4 + $0x1e8] sm:$0xff] }
  0x21   :  { %1755 = vmatpush1.bf16.msra.mxu0 %v1754_v61  ;;  %v837_v61 = vld [vmem:[%s2830_s4 + $0x1c0] sm:$0xff]  ;;  %v1786_v16 = vpack.c.bf16 %v796_v14, %v795_v13  ;;  %v823_v17 = vld [vmem:[%s2830_s4 + $0x150] sm:$0xff]  ;;  %v826_v26 = vld [vmem:[%s2830_s4 + $0x168] sm:$0xff] }
  0x22   :  { %1789 = vmatprep.subr.bf16.mxu0 %v1788_v18  ;;  %v1804_v2 = vpack.c.bf16 %v838_v63, %v837_v61  ;;  %v824_v18 = vld [vmem:[%s2830_s4 + $0x158] sm:$0xff]  ;;  %v827_v32 = vld [vmem:[%s2830_s4 + $0x170] sm:$0xff]  ;;  %v893_v35 = vld [vmem:[%s2830_s4 + $0x380] sm:$0xff] }
  0x23   :  { %v1810_v19 = vpack.c.bf16 %v824_v18, %v823_v17  ;;  %v844_v30 = vld [vmem:[%s2830_s4 + $0x1f8] sm:$0xff]  ;;  %v894_v36 = vld [vmem:[%s2830_s4 + $0x388] sm:$0xff] }
  0x24   :  { %1511 = vmatmul.mubr.msk.f32.vlgmr.msra.gmra.mrb[6].mxu0 %vm70_vm0, %v29_v25  ;;  %v1768_v25 = vpack.c.bf16 %v804_v24, %v803_v23  ;;  %v1812_v23 = vpack.c.bf16 %v842_v21, %v841_v20  ;;  %v862_v24 = vld [vmem:[%s2830_s4 + $0x288] sm:$0xff]  ;;  %v1852_v37 = vpack.c.bf16 %v894_v36, %v893_v35 }
  0x25   :  { %1791 = vmatpush3.bf16.msra.mxu0 %v1790_v22  ;;  %v861_v22 = vld [vmem:[%s2830_s4 + $0x280] sm:$0xff] }
  0x26   :  { %1769 = vmatprep.subr.bf16.mxu1 %v1768_v25  ;;  %1793 = vmatprep.subr.bf16.mxu0 %v1792_v29  ;;  %v825_v25 = vld [vmem:[%s2830_s4 + $0x160] sm:$0xff]  ;;  %v1820_v27 = vpack.c.bf16 %v862_v24, %v861_v22  ;;  %v843_v29 = vld [vmem:[%s2830_s4 + $0x1f0] sm:$0xff] }
  0x27   :  { %1771 = vmatpush3.bf16.msra.mxu1 %v1770_v33  ;;  %v1814_v28 = vpack.c.bf16 %v826_v26, %v825_v25  ;;  %v1816_v31 = vpack.c.bf16 %v844_v30, %v843_v29  ;;  %v828_v33 = vld [vmem:[%s2830_s4 + $0x178] sm:$0xff] }
  0x28   :  { %1773 = vmatprep.subr.bf16.mxu1 %v1772_v38 }
  0x29   :  { %1795 = vmatpush3.bf16.msra.mxu0 %v1794_v34  ;;  %v1818_v34 = vpack.c.bf16 %v828_v33, %v827_v32 }
  0x2a   :  { %1797 = vmatprep.subr.bf16.mxu0 %v1796_v42 }
  0x2b   :  { %1775 = vmatpush3.bf16.msra.mxu1 %v1774_v43  ;;  %v625_v43 = vlaneseq }
  0x2c   :  { %1777 = vmatprep.subr.bf16.mxu1 %v1776_v50 }
  0x2d   :  { %1799 = vmatpush3.bf16.msra.mxu0 %v1798_v46  ;;  %v2341_v51 = vshrl.u32 %v625_v43, 7 }
  0x2e   :  { %1801 = vmatprep.subr.bf16.mxu0 %v1800_v54 }
  0x2f   :  { %1779 = vmatpush3.bf16.msra.mxu1 %v1778_v55  ;;  %v2345_v1 = vsub.s32 0, %v2341_v51  ;;  %v2355_v14 = vsub.s32 1, %v2341_v51 }
  0x30   :  { %1781 = vmatprep.subr.bf16.mxu1 %v1780_v62 }
  0x31   :  { %1803 = vmatpush3.bf16.msra.mxu0 %v1802_v58 }
  0x32   :  { %1805 = vmatprep.subr.bf16.mxu0 %v1804_v2 }
  0x33   :  { %1783 = vmatpush3.bf16.msra.mxu1 %v1782_v4 }
  0x34   :  { %1785 = vmatprep.subr.bf16.mxu1 %v1784_v11 }
  0x35   :  { %1807 = vmatpush3.bf16.msra.mxu0 %v1806_v7  ;;  %v2350_v7 = vld [vmem:[%s2831_s3] ss:$2 sm:$0xff] }
  0x36   :  { %1809 = vmatprep.subr.bf16.mxu0 %v1808_v15  ;;  %v628_v17 = vrot.slane %v2350_v7, %v2345_v1 }
  0x37   :  { %1787 = vmatpush3.bf16.msra.mxu1 %v1786_v16 }
  0x38   :  { %1821 = vmatprep.subr.bf16.mxu1 %v1820_v27 }
  0x39   :  { %1811 = vmatpush3.bf16.msra.mxu0 %v1810_v19 }
  0x3a   :  { %1813 = vmatprep.subr.bf16.mxu0 %v1812_v23 }
  0x3d   :  { %1815 = vmatpush3.bf16.msra.mxu0 %v1814_v28 }
  0x3e   :  { %1817 = vmatprep.subr.bf16.mxu0 %v1816_v31 }
  0x41   :  { %1819 = vmatpush3.bf16.msra.mxu0 %v1818_v34 }
  0x42   :  { %1853 = vmatprep.subr.bf16.mxu0 %v1852_v37 }
  0xdf   :  { %v140_v38 = vpop.f32.mrb[0].mxu0 }
  0xe0   :  { %v429_v39 = vrot.slane %v140_v38, 4  ;;  %v142_v40 = vpop.f32.mrb[1].mxu0 }
  0xe1   :  { %v435_v41 = vrot.slane %v142_v40, 4 }
  0xe2   :  { %v430_v42 = vadd.f32 %v429_v39, %v140_v38 }
  0xe3   :  { %v436_v44 = vadd.f32 %v435_v41, %v142_v40 }
  0xe4   :  { %v431_v45 = vrot.slane %v430_v42, 2  ;;  %v2338_v47 = vpop.f32.mrb[0].mxu1 }
  0xe5   :  { %v437_v46 = vrot.slane %v436_v44, 2  ;;  %v465_v49 = vrot.slane %v2338_v47, 4  ;;  %v355_v50 = vpop.f32.mrb[1].mxu1 }
  0xe6   :  { %v432_v48 = vadd.f32 %v431_v45, %v430_v42  ;;  %v471_v54 = vrot.slane %v355_v50, 4 }
  0xe7   :  { %v438_v52 = vadd.f32 %v437_v46, %v436_v44  ;;  %v211_v53 = vpop.f32.mrb[2].mxu0  ;;  %v466_v58 = vadd.f32 %v465_v49, %v2338_v47 }
  0xe8   :  { %v433_v55 = vrot.slane %v432_v48, 1  ;;  %v441_v56 = vrot.slane %v211_v53, 4  ;;  %v213_v57 = vpop.f32.mrb[3].mxu0  ;;  %v472_v61 = vadd.f32 %v471_v54, %v355_v50 }
  0xe9   :  { %v439_v59 = vrot.slane %v438_v52, 1  ;;  %v447_v60 = vrot.slane %v213_v57, 4  ;;  %v467_v0 = vrot.slane %v466_v58, 2 }
  0xea   :  { %v434_v62 = vadd.f32 %v433_v55, %v432_v48  ;;  %v442_v63 = vadd.f32 %v441_v56, %v211_v53  ;;  %v473_v5 = vrot.slane %v472_v61, 2 }
  0xeb   :  { %v440_v2 = vadd.f32 %v439_v59, %v438_v52  ;;  %v448_v4 = vadd.f32 %v447_v60, %v213_v57  ;;  %v468_v9 = vadd.f32 %v467_v0, %v466_v58 }
  0xec   :  { %v490_v6 = vmul.f32 0.125, %v434_v62  ;;  %v443_v8 = vrot.slane %v442_v63, 2  ;;  %v474_v12 = vadd.f32 %v473_v5, %v472_v61 }
  0xed   :  { %v491_v10 = vmul.f32 0.125, %v440_v2  ;;  %v449_v11 = vrot.slane %v448_v4, 2  ;;  %v469_v16 = vrot.slane %v468_v9, 1 }
  0xee   :  { %v2352_v13 = vsub.f32 %v140_v38, %v490_v6  ;;  %v444_v15 = vadd.f32 %v443_v8, %v442_v63  ;;  %v475_v21 = vrot.slane %v474_v12, 1 }
  0xef   :  { %v2359_v18 = vsub.f32 %v142_v40, %v491_v10  ;;  %v450_v19 = vadd.f32 %v449_v11, %v448_v4  ;;  %v2361_v20 = vpop.f32.mrb[4].mxu0  ;;  %v470_v24 = vadd.f32 %v469_v16, %v468_v9  ;;  %v632_v40 = vrot.slane %v2350_v7, %v2355_v14 }
  0xf0   :  { %v510_v22 = vmul.f32 %v2352_v13, %v2352_v13  ;;  %v445_v23 = vrot.slane %v444_v15, 1  ;;  %v453_v25 = vrot.slane %v2361_v20, 4  ;;  %v284_v26 = vpop.f32.mrb[5].mxu0  ;;  %v476_v29 = vadd.f32 %v475_v21, %v474_v12 }
  0xf1   :  { %v511_v27 = vmul.f32 %v2359_v18, %v2359_v18  ;;  %v451_v28 = vrot.slane %v450_v19, 1  ;;  %v459_v30 = vrot.slane %v284_v26, 4  ;;  %v496_v33 = vmul.f32 0.125, %v470_v24 }
  0xf2   :  { %v520_v31 = vrot.slane %v510_v22, 4  ;;  %v446_v32 = vadd.f32 %v445_v23, %v444_v15  ;;  %v454_v34 = vadd.f32 %v453_v25, %v2361_v20  ;;  %v497_v37 = vmul.f32 0.125, %v476_v29 }
  0xf3   :  { %v526_v35 = vrot.slane %v511_v27, 4  ;;  %v452_v36 = vadd.f32 %v451_v28, %v450_v19  ;;  %v460_v38 = vadd.f32 %v459_v30, %v284_v26  ;;  %v2376_v52 = vsub.f32 %v2338_v47, %v496_v33 }
  0xf4   :  { %v521_v39 = vadd.f32 %v520_v31, %v510_v22  ;;  %v492_v41 = vmul.f32 0.125, %v446_v32  ;;  %v455_v42 = vrot.slane %v454_v34, 2  ;;  %v2371_v45 = vsub.f32 %v355_v50, %v497_v37 }
  0xf5   :  { %v527_v43 = vadd.f32 %v526_v35, %v511_v27  ;;  %v493_v44 = vmul.f32 0.125, %v452_v36  ;;  %v461_v46 = vrot.slane %v460_v38, 2  ;;  %v516_v6 = vmul.f32 %v2376_v52, %v2376_v52 }
  0xf6   :  { %v522_v48 = vrot.slane %v521_v39, 2  ;;  %v2373_v49 = vsub.f32 %v211_v53, %v492_v41  ;;  %v456_v54 = vadd.f32 %v455_v42, %v454_v34  ;;  %v517_v58 = vmul.f32 %v2371_v45, %v2371_v45 }
  0xf7   :  { %v528_v55 = vrot.slane %v527_v43, 2  ;;  %v2378_v56 = vsub.f32 %v213_v57, %v493_v44  ;;  %v462_v59 = vadd.f32 %v461_v46, %v460_v38  ;;  %v2382_v60 = vpop.f32.mrb[6].mxu0  ;;  %v635_v53 = vsub.s32 2, %v2341_v51 }
  0xf8   :  { %v523_v61 = vadd.f32 %v522_v48, %v521_v39  ;;  %v512_v50 = vmul.f32 %v2373_v49, %v2373_v49  ;;  %v457_v62 = vrot.slane %v456_v54, 1  ;;  %v2387_v63 = vpop.f32.mrb[7].mxu0  ;;  %v562_v0 = vrot.slane %v517_v58, 4 }
  0xf9   :  { %v529_v47 = vadd.f32 %v528_v55, %v527_v43  ;;  %v513_v57 = vmul.f32 %v2378_v56, %v2378_v56  ;;  %v463_v2 = vrot.slane %v462_v59, 1  ;;  %v639_v19 = vsub.s32 3, %v2341_v51 }
  0xfa   :  { %v524_v4 = vrot.slane %v523_v61, 1  ;;  %v532_v5 = vrot.slane %v512_v50, 4  ;;  %v458_v8 = vadd.f32 %v457_v62, %v456_v54  ;;  %v563_v11 = vadd.f32 %v562_v0, %v517_v58 }
  0xfb   :  { %v530_v9 = vrot.slane %v529_v47, 1  ;;  %v538_v10 = vrot.slane %v513_v57, 4  ;;  %v464_v12 = vadd.f32 %v463_v2, %v462_v59  ;;  %v556_v29 = vrot.slane %v516_v6, 4 }
  0xfc   :  { %v525_v15 = vadd.f32 %v524_v4, %v523_v61  ;;  %v533_v16 = vadd.f32 %v532_v5, %v512_v50  ;;  %v494_v21 = vmul.f32 0.125, %v458_v8  ;;  %v564_v24 = vrot.slane %v563_v11, 2 }
  0xfd   :  { %v531_v22 = vadd.f32 %v530_v9, %v529_v47  ;;  %v539_v23 = vadd.f32 %v538_v10, %v513_v57  ;;  %v495_v25 = vmul.f32 0.125, %v464_v12  ;;  %v2402_v37 = vrot.slane %v2350_v7, %v635_v53 }
  0xfe   :  { %v580_v27 = vmul.f32 0.125, %v525_v15  ;;  %v534_v28 = vrot.slane %v533_v16, 2  ;;  %v2395_v30 = vsub.f32 %v2361_v20, %v494_v21  ;;  %v565_v33 = vadd.f32 %v564_v24, %v563_v11  ;;  %v2421_v24 = vld [vmem:[%s2831_s3 + $0x1] ss:$2 sm:$0xff] }
  0xff   :  { %v581_v31 = vmul.f32 0.125, %v531_v22  ;;  %v540_v32 = vrot.slane %v539_v23, 2  ;;  %v2397_v34 = vsub.f32 %v284_v26, %v495_v25  ;;  %v557_v26 = vadd.f32 %v556_v29, %v516_v6 }
 0x100   :  { %v590_v35 = vadd.f32 1e-05, %v580_v27  ;;  %v535_v36 = vadd.f32 %v534_v28, %v533_v16  ;;  %v514_v38 = vmul.f32 %v2395_v30, %v2395_v30  ;;  %v566_v42 = vrot.slane %v565_v33, 1 }
 0x101   :  { %v591_v39 = vadd.f32 1e-05, %v581_v31  ;;  %v541_v41 = vadd.f32 %v540_v32, %v539_v23  ;;  %v515_v20 = vmul.f32 %v2397_v34, %v2397_v34  ;;  %v2411_v58 = vrot.slane %v2350_v7, %v639_v19 }
 0x102   :  { %1927 = vrsqrt.f32 %v590_v35  ;;  %v536_v43 = vrot.slane %v535_v36, 1  ;;  %v544_v44 = vrot.slane %v514_v38, 4  ;;  %v567_v48 = vadd.f32 %v566_v42, %v565_v33  ;;  %v2427_v33 = vld [vmem:[%s2830_s4 + $0x200] sm:$0xff]  ;;  %v2432_v35 = vld [vmem:[%s2830_s4 + $0x208] sm:$0xff] }
 0x103   :  { %1929 = vrsqrt.f32 %v591_v39  ;;  %v542_v46 = vrot.slane %v541_v41, 1  ;;  %v550_v54 = vrot.slane %v515_v20, 4  ;;  %v477_v61 = vrot.slane %v2382_v60, 4 }
 0x104   :  { %v537_v55 = vadd.f32 %v536_v43, %v535_v36  ;;  %v545_v59 = vadd.f32 %v544_v44, %v514_v38  ;;  %v587_v62 = vmul.f32 0.125, %v567_v48  ;;  %v483_v57 = vrot.slane %v2387_v63, 4 }
 0x105   :  { %v543_v50 = vadd.f32 %v542_v46, %v541_v41  ;;  %v551_v47 = vadd.f32 %v550_v54, %v515_v20  ;;  %v558_v2 = vrot.slane %v557_v26, 2  ;;  %v478_v5 = vadd.f32 %v477_v61, %v2382_v60 }
 0x106   :  { %v582_v0 = vmul.f32 0.125, %v537_v55  ;;  %v546_v4 = vrot.slane %v545_v59, 2  ;;  %v597_v8 = vadd.f32 1e-05, %v587_v62  ;;  %v484_v10 = vadd.f32 %v483_v57, %v2387_v63 }
 0x107   :  { %v583_v6 = vmul.f32 0.125, %v543_v50  ;;  %v552_v9 = vrot.slane %v551_v47, 2  ;;  %v655_v15 = vsub.s32 7, %v2341_v51  ;;  %v479_v16 = vrot.slane %v478_v5, 2 }
 0x108   :  { %v592_v11 = vadd.f32 1e-05, %v582_v0  ;;  %v547_v12 = vadd.f32 %v546_v4, %v545_v59  ;;  %1931 = vrsqrt.f32 %v597_v8  ;;  %v485_v23 = vrot.slane %v484_v10, 2 }
 0x109   :  { %v593_v21 = vadd.f32 1e-05, %v583_v6  ;;  %v553_v22 = vadd.f32 %v552_v9, %v551_v47  ;;  %v647_v27 = vsub.s32 5, %v2341_v51  ;;  %v480_v28 = vadd.f32 %v479_v16, %v478_v5  ;;  %v864_v47 = vld [vmem:[%s2830_s4 + $0x298] sm:$0xff] }
 0x10a   :  { %1933 = vrsqrt.f32 %v592_v11  ;;  %v548_v25 = vrot.slane %v547_v12, 1  ;;  %v559_v29 = vadd.f32 %v558_v2, %v557_v26  ;;  %v486_v32 = vadd.f32 %v485_v23, %v484_v10  ;;  %v847_v23 = vld [vmem:[%s2830_s4 + $0x210] sm:$0xff] }
 0x10b   :  { %1935 = vrsqrt.f32 %v593_v21  ;;  %v554_v31 = vrot.slane %v553_v22, 1  ;;  %v656_v38 = vrot.slane %v2350_v7, %v655_v15  ;;  %v481_v39 = vrot.slane %v480_v28, 1 }
 0x10c   :  { %v1928_v36 = vpop.eup %1927  ;;  %v698_v41 = vrot.slane %v2421_v24, %v2355_v14  ;;  %v694_v42 = vrot.slane %v2421_v24, %v2345_v1  ;;  %v549_v26 = vadd.f32 %v548_v25, %v547_v12  ;;  %v487_v46 = vrot.slane %v486_v32, 1 }
 0x10d   :  { %v1930_v20 = vpop.eup %1929  ;;  %v610_v43 = vmul.f32 %v1928_v36, %v2352_v13  ;;  %v555_v44 = vadd.f32 %v554_v31, %v553_v22  ;;  %v2444_v54 = vrot.slane %v2350_v7, %v647_v27  ;;  %v482_v55 = vadd.f32 %v481_v39, %v480_v28 }
 0x10e   :  { %v611_v48 = vmul.f32 %v1930_v20, %v2359_v18  ;;  %v1822_v59 = vpack.c.bf16 %v2432_v35, %v2427_v33  ;;  %v560_v50 = vrot.slane %v559_v29, 1  ;;  %v488_v62 = vadd.f32 %v487_v46, %v486_v32  ;;  %v863_v18 = vld [vmem:[%s2830_s4 + $0x290] sm:$0xff]  ;;  %v866_v32 = vld [vmem:[%s2830_s4 + $0x2a8] sm:$0xff]  ;;  %v2494_v33 = vld [vmem:[%s2830_s4 + $0x220] sm:$0xff] }
 0x10f   :  { %v675_v61 = vmul.f32 %v628_v17, %v610_v43  ;;  %v585_v13 = vmul.f32 0.125, %v555_v44  ;;  %v498_v0 = vmul.f32 0.125, %v482_v55  ;;  %v706_v17 = vrot.slane %v2421_v24, %v639_v19  ;;  %v878_v20 = vld [vmem:[%s2830_s4 + $0x308] sm:$0xff] }
 0x110   :  { %v676_v57 = vmul.f32 %v632_v40, %v611_v48  ;;  %v702_v2 = vrot.slane %v2421_v24, %v635_v53  ;;  %v584_v4 = vmul.f32 0.125, %v549_v26  ;;  %v499_v6 = vmul.f32 0.125, %v488_v62 }
 0x111   :  { %v595_v5 = vadd.f32 1e-05, %v585_v13  ;;  %v741_v8 = vadd.f32 %v694_v42, %v675_v61  ;;  %v2467_v9 = vsub.f32 %v2382_v60, %v498_v0  ;;  %v1824_v11 = vpack.c.bf16 %v864_v47, %v863_v18  ;;  %v2505_v42 = vld [vmem:[%s2830_s4 + $0x300] sm:$0xff]  ;;  %v896_v0 = vld [vmem:[%s2830_s4 + $0x398] sm:$0xff] }
 0x112   :  { %v742_v10 = vadd.f32 %v698_v41, %v676_v57  ;;  %v722_v40 = vrot.slane %v2421_v24, %v655_v15  ;;  %v1932_v12 = vpop.eup %1931  ;;  %v561_v16 = vadd.f32 %v560_v50, %v559_v29  ;;  %v2471_v19 = vsub.f32 %v2387_v63, %v499_v6  ;;  %v848_v15 = vld [vmem:[%s2830_s4 + $0x218] sm:$0xff]  ;;  %v865_v63 = vld [vmem:[%s2830_s4 + $0x2a0] sm:$0xff] }
 0x113   :  { %1937 = vrsqrt.f32 %v595_v5  ;;  %vm751_vm1 = vcmp.gt.f32.partialorder %v741_v8, 0.0  ;;  %v617_v53 = vmul.f32 %v1932_v12, %v2371_v45  ;;  %v518_v22 = vmul.f32 %v2467_v9, %v2467_v9  ;;  %v868_v57 = vld [vmem:[%s2830_s4 + $0x2b8] sm:$0xff] }
 0x114   :  { %v1934_v21 = vpop.eup %1933  ;;  %vm752_vm2 = vcmp.gt.f32.partialorder %v742_v10, 0.0  ;;  %v762_v60 = vmul.f32 0.1, %v742_v10  ;;  %v594_v28 = vadd.f32 1e-05, %v584_v4  ;;  %v519_v29 = vmul.f32 %v2471_v19, %v2471_v19 }
 0x115   :  { %v1936_v25 = vpop.eup %1935  ;;  %v612_v45 = vmul.f32 %v1934_v21, %v2373_v49  ;;  %v761_v31 = vmul.f32 0.1, %v741_v8  ;;  %v682_v36 = vmul.f32 %v656_v38, %v617_v53  ;;  %v568_v39 = vrot.slane %v518_v22, 4  ;;  %v2500_v49 = vld [vmem:[%s2830_s4 + $0x228] sm:$0xff]  ;;  %v852_v21 = vld [vmem:[%s2830_s4 + $0x238] sm:$0xff] }
 0x116   :  { %v613_v35 = vmul.f32 %v1936_v25, %v2378_v56  ;;  %v772_v41 = vsel %vm752_vm2, %v742_v10, %v762_v60  ;;  %v574_v56 = vrot.slane %v519_v29, 4  ;;  %v1826_v26 = vpack.c.bf16 %v848_v15, %v847_v23  ;;  %v880_v15 = vld [vmem:[%s2830_s4 + $0x318] sm:$0xff]  ;;  %v870_v25 = vld [vmem:[%s2830_s4 + $0x2c8] sm:$0xff] }
 0x117   :  { %v677_v43 = vmul.f32 %v2402_v37, %v612_v45  ;;  %1005 = vmatprep.mubr.f32.mxu1 %v772_v41  ;;  %v771_v38 = vsel %vm751_vm1, %v741_v8, %v761_v31  ;;  %v569_v46 = vadd.f32 %v568_v39, %v518_v22  ;;  %v1828_v48 = vpack.c.bf16 %v866_v32, %v865_v63  ;;  %v867_v37 = vld [vmem:[%s2830_s4 + $0x2b0] sm:$0xff]  ;;  %v869_v63 = vld [vmem:[%s2830_s4 + $0x2c0] sm:$0xff] }
 0x118   :  { %v678_v44 = vmul.f32 %v2411_v58, %v613_v35  ;;  %1006 = vmatmul.mubr.f32.vlgmr.msra.gmra.mrb[2].mxu1 %v771_v38  ;;  %v748_v55 = vadd.f32 %v722_v40, %v682_v36  ;;  %v575_v61 = vadd.f32 %v574_v56, %v519_v29  ;;  %v1830_v13 = vpack.c.bf16 %v2500_v49, %v2494_v33  ;;  %v898_v29 = vld [vmem:[%s2830_s4 + $0x3a8] sm:$0xff]  ;;  %v853_v49 = vld [vmem:[%s2830_s4 + $0x240] sm:$0xff] }
 0x119   :  { %1823 = vmatpush3.bf16.msra.mxu1 %v1822_v59  ;;  %v743_v50 = vadd.f32 %v702_v2, %v677_v43  ;;  %v1854_v62 = vpack.c.bf16 %v878_v20, %v2505_v42  ;;  %v586_v18 = vmul.f32 0.125, %v561_v16  ;;  %1939 = vrsqrt.f32 %v594_v28  ;;  %v895_v59 = vld [vmem:[%s2830_s4 + $0x390] sm:$0xff]  ;;  %v854_v42 = vld [vmem:[%s2830_s4 + $0x248] sm:$0xff]  ;;  %v881_v56 = vld [vmem:[%s2830_s4 + $0x320] sm:$0xff] }
 0x11a   :  { %v570_v47 = vrot.slane %v569_v46, 2  ;;  %1825 = vmatprep.subr.bf16.mxu1 %v1824_v11  ;;  %v744_v58 = vadd.f32 %v706_v17, %v678_v44  ;;  %v576_v2 = vrot.slane %v575_v61, 2  ;;  %v768_v5 = vmul.f32 0.1, %v748_v55  ;;  %v851_v16 = vld [vmem:[%s2830_s4 + $0x230] sm:$0xff]  ;;  %v882_v38 = vld [vmem:[%s2830_s4 + $0x328] sm:$0xff] }
 0x11b   :  { %v763_v4 = vmul.f32 0.1, %v743_v50  ;;  %v714_v6 = vrot.slane %v2421_v24, %v647_v27  ;;  %vm753_vm4 = vcmp.gt.f32.partialorder %v743_v50, 0.0  ;;  %v1832_v40 = vpack.c.bf16 %v868_v57, %v867_v37  ;;  %v879_v27 = vld [vmem:[%s2830_s4 + $0x310] sm:$0xff]  ;;  %v856_v57 = vld [vmem:[%s2830_s4 + $0x258] sm:$0xff] }
 0x11c   :  { %v571_v17 = vadd.f32 %v570_v47, %v569_v46  ;;  %vm754_vm3 = vcmp.gt.f32.partialorder %v744_v58, 0.0  ;;  %v764_v8 = vmul.f32 0.1, %v744_v58  ;;  %v577_v11 = vadd.f32 %v576_v2, %v575_v61  ;;  %v900_v61 = vld [vmem:[%s2830_s4 + $0x3b8] sm:$0xff] }
 0x11d   :  { %v1938_v10 = vpop.eup %1937  ;;  %1827 = vmatpush3.bf16.msra.mxu1 %v1826_v26  ;;  %v1856_v12 = vpack.c.bf16 %v896_v0, %v895_v59  ;;  %vm758_vm5 = vcmp.gt.f32.partialorder %v748_v55, 0.0  ;;  %v596_v53 = vadd.f32 1e-05, %v586_v18  ;;  %v773_v28 = vsel %vm753_vm4, %v743_v50, %v763_v4  ;;  %v871_v26 = vld [vmem:[%s2830_s4 + $0x2d0] sm:$0xff] }
 0x11e   :  { %v615_v22 = vmul.f32 %v1938_v10, %v2397_v34  ;;  %v572_v60 = vrot.slane %v571_v17, 1  ;;  %v774_v23 = vsel %vm754_vm3, %v744_v58, %v764_v8  ;;  %1829 = vmatprep.subr.bf16.mxu1 %v1828_v48  ;;  %v578_v45 = vrot.slane %v577_v11, 1  ;;  %v897_v34 = vld [vmem:[%s2830_s4 + $0x3a0] sm:$0xff]  ;;  %v872_v48 = vld [vmem:[%s2830_s4 + $0x2d8] sm:$0xff]  ;;  %v855_v58 = vld [vmem:[%s2830_s4 + $0x250] sm:$0xff] }
 0x11f   :  { %1075 = vmatprep.mubr.f32.mxu0 %v774_v23  ;;  %v1834_v33 = vpack.c.bf16 %v852_v21, %v851_v16  ;;  %v778_v35 = vsel %vm758_vm5, %v748_v55, %v768_v5  ;;  %v1858_v39 = vpack.c.bf16 %v880_v15, %v879_v27  ;;  %v1836_v41 = vpack.c.bf16 %v870_v25, %v869_v63  ;;  %v899_v55 = vld [vmem:[%s2830_s4 + $0x3b0] sm:$0xff]  ;;  %v884_v5 = vld [vmem:[%s2830_s4 + $0x338] sm:$0xff]  ;;  %v874_v10 = vld [vmem:[%s2830_s4 + $0x2e8] sm:$0xff] }
 0x120   :  { %v680_v31 = vmul.f32 %v2444_v54, %v615_v22  ;;  %v573_v32 = vadd.f32 %v572_v60, %v571_v17  ;;  %1076 = vmatmul.mubr.f32.vlgmr.msra.gmra.mrb[8].mxu0 %v773_v28  ;;  %v579_v36 = vadd.f32 %v578_v45, %v577_v11  ;;  %1941 = vrsqrt.f32 %v596_v53  ;;  %v883_v4 = vld [vmem:[%s2830_s4 + $0x330] sm:$0xff]  ;;  %v901_v11 = vld [vmem:[%s2830_s4 + $0x3c0] sm:$0xff]  ;;  %v858_v21 = vld [vmem:[%s2830_s4 + $0x268] sm:$0xff] }
 0x121   :  { %1831 = vmatpush3.bf16.msra.mxu1 %v1830_v13  ;;  %1855 = vmatpush3.bf16.msra.mxu0 %v1854_v62  ;;  %v1860_v43 = vpack.c.bf16 %v898_v29, %v897_v34  ;;  %v643_v44 = vsub.s32 4, %v2341_v51  ;;  %v1838_v18 = vpack.c.bf16 %v854_v42, %v853_v49  ;;  %v1862_v47 = vpack.c.bf16 %v882_v38, %v881_v56  ;;  %v857_v16 = vld [vmem:[%s2830_s4 + $0x260] sm:$0xff]  ;;  %v886_v60 = vld [vmem:[%s2830_s4 + $0x348] sm:$0xff]  ;;  %v875_v23 = vld [vmem:[%s2830_s4 + $0x2f0] sm:$0xff] }
 0x122   :  { %v588_v54 = vmul.f32 0.125, %v573_v32  ;;  %1833 = vmatprep.subr.bf16.mxu1 %v1832_v40  ;;  %1857 = vmatprep.subr.bf16.mxu0 %v1856_v12  ;;  %v746_v20 = vadd.f32 %v714_v6, %v680_v31  ;;  %v589_v46 = vmul.f32 0.125, %v579_v36  ;;  %v1840_v0 = vpack.c.bf16 %v872_v48, %v871_v26  ;;  %v873_v6 = vld [vmem:[%s2830_s4 + $0x2e0] sm:$0xff]  ;;  %v902_v40 = vld [vmem:[%s2830_s4 + $0x3c8] sm:$0xff]  ;;  %v876_v25 = vld [vmem:[%s2830_s4 + $0x2f8] sm:$0xff] }
 0x123   :  { %1215 = vmatprep.mubr.f32.mxu0 %v778_v35  ;;  %v1940_v50 = vpop.eup %1939  ;;  %v1864_v2 = vpack.c.bf16 %v900_v61, %v899_v55  ;;  %v644_v8 = vrot.slane %v2350_v7, %v643_v44  ;;  %v1842_v12 = vpack.c.bf16 %v856_v57, %v855_v58  ;;  %v1844_v27 = vpack.c.bf16 %v874_v10, %v873_v6  ;;  %v885_v22 = vld [vmem:[%s2830_s4 + $0x340] sm:$0xff]  ;;  %v903_v45 = vld [vmem:[%s2830_s4 + $0x3d0] sm:$0xff]  ;;  %v904_v28 = vld [vmem:[%s2830_s4 + $0x3d8] sm:$0xff] }
 0x124   :  { %v598_v13 = vadd.f32 1e-05, %v588_v54  ;;  %vm756_vm6 = vcmp.gt.f32.partialorder %v746_v20, 0.0  ;;  %v766_v62 = vmul.f32 0.1, %v746_v20  ;;  %v614_v17 = vmul.f32 %v1940_v50, %v2395_v30  ;;  %v860_v35 = vld [vmem:[%s2830_s4 + $0x278] sm:$0xff] }
 0x125   :  { %v599_v37 = vadd.f32 1e-05, %v589_v46  ;;  %1835 = vmatpush3.bf16.msra.mxu1 %v1834_v33  ;;  %1859 = vmatpush3.bf16.msra.mxu0 %v1858_v39  ;;  %v1866_v30 = vpack.c.bf16 %v884_v5, %v883_v4  ;;  %v1868_v53 = vpack.c.bf16 %v902_v40, %v901_v11  ;;  %v651_v15 = vsub.s32 6, %v2341_v51  ;;  %v1512_v51 = vld [vmem:[%s2831_s3 + $0x10] ss:$2 sm:$0x3] }
 0x126   :  { %1943 = vrsqrt.f32 %v598_v13  ;;  %1837 = vmatprep.subr.bf16.mxu1 %v1836_v41  ;;  %v776_v59 = vsel %vm756_vm6, %v746_v20, %v766_v62  ;;  %1861 = vmatprep.subr.bf16.mxu0 %v1860_v43  ;;  %v679_v63 = vmul.f32 %v644_v8, %v614_v17  ;;  %v710_v34 = vrot.slane %v2421_v24, %v643_v44  ;;  %v859_v33 = vld [vmem:[%s2830_s4 + $0x270] sm:$0xff]  ;;  %v888_v42 = vld [vmem:[%s2830_s4 + $0x358] sm:$0xff]  ;;  %v905_v54 = vld [vmem:[%s2830_s4 + $0x3e0] sm:$0xff] }
 0x127   :  { %1945 = vrsqrt.f32 %v599_v37  ;;  %1145 = vmatprep.mubr.f32.mxu1 %v776_v59  ;;  %v1846_v31 = vpack.c.bf16 %v858_v21, %v857_v16  ;;  %v1870_v32 = vpack.c.bf16 %v886_v60, %v885_v22  ;;  %v1514_v36 = vld [vmem:[%s2831_s3 + $0x11] ss:$2 sm:$0x3]  ;;  %v1848_v39 = vpack.c.bf16 %v876_v25, %v875_v23  ;;  %v906_v26 = vld [vmem:[%s2830_s4 + $0x3e8] sm:$0xff]  ;;  %v925_v44 = vld [vmem:[%s2830_s4 + $0x480] sm:$0xff] }
 0x128   :  { %v1872_v41 = vpack.c.bf16 %v904_v28, %v903_v45  ;;  %v887_v49 = vld [vmem:[%s2830_s4 + $0x350] sm:$0xff]  ;;  %v652_v43 = vrot.slane %v2350_v7, %v651_v15  ;;  %v660_v56 = vrot.slane %v1512_v51, %v2345_v1  ;;  %v745_v38 = vadd.f32 %v710_v34, %v679_v63  ;;  %v926_v46 = vld [vmem:[%s2830_s4 + $0x488] sm:$0xff]  ;;  %v889_v37 = vld [vmem:[%s2830_s4 + $0x360] sm:$0xff] }
 0x129   :  { %1839 = vmatpush3.bf16.msra.mxu1 %v1838_v18  ;;  %1863 = vmatpush3.bf16.msra.mxu0 %v1862_v47  ;;  %v730_v7 = vrot.slane %v1514_v36, %v2355_v14  ;;  %v726_v55 = vrot.slane %v1514_v36, %v2345_v1  ;;  %v1850_v13 = vpack.c.bf16 %v860_v35, %v859_v33  ;;  %v890_v18 = vld [vmem:[%s2830_s4 + $0x368] sm:$0xff]  ;;  %v907_v57 = vld [vmem:[%s2830_s4 + $0x3f0] sm:$0xff]  ;;  %v928_v5 = vld [vmem:[%s2830_s4 + $0x498] sm:$0xff] }
 0x12a   :  { %1841 = vmatprep.subr.bf16.mxu1 %v1840_v0  ;;  %1865 = vmatprep.subr.bf16.mxu0 %v1864_v2  ;;  %v1942_v29 = vpop.eup %1941  ;;  %v1874_v62 = vpack.c.bf16 %v888_v42, %v887_v49  ;;  %v1876_v1 = vpack.c.bf16 %v906_v26, %v905_v54  ;;  %v910_v58 = vld [vmem:[%s2830_s4 + $0x408] sm:$0xff]  ;;  %v765_v2 = vmul.f32 0.1, %v745_v38  ;;  %v927_v4 = vld [vmem:[%s2830_s4 + $0x490] sm:$0xff]  ;;  %v718_v6 = vrot.slane %v2421_v24, %v651_v15  ;;  %v892_v24 = vld [vmem:[%s2830_s4 + $0x378] sm:$0xff] }
 0x12b   :  { %v616_v20 = vmul.f32 %v1942_v29, %v2376_v52  ;;  %v664_v52 = vrot.slane %v1512_v51, %v2355_v14  ;;  %v1884_v14 = vpack.c.bf16 %v926_v46, %v925_v44  ;;  %vm755_vm7 = vcmp.gt.f32.partialorder %v745_v38, 0.0  ;;  %v891_v11 = vld [vmem:[%s2830_s4 + $0x370] sm:$0xff]  ;;  %v929_v60 = vld [vmem:[%s2830_s4 + $0x4a0] sm:$0xff]  ;;  %v930_v23 = vld [vmem:[%s2830_s4 + $0x4a8] sm:$0xff] }
 0x12c   :  { %v1878_v8 = vpack.c.bf16 %v890_v18, %v889_v37  ;;  %v1888_v16 = vpack.c.bf16 %v928_v5, %v927_v4  ;;  %v911_v21 = vld [vmem:[%s2830_s4 + $0x410] sm:$0xff]  ;;  %v1882_v63 = vpack.c.bf16 %v892_v24, %v891_v11  ;;  %v1892_v28 = vpack.c.bf16 %v930_v23, %v929_v60  ;;  %v913_v34 = vld [vmem:[%s2830_s4 + $0x420] sm:$0xff]  ;;  %v914_v29 = vld [vmem:[%s2830_s4 + $0x428] sm:$0xff] }
 0x12d   :  { %1843 = vmatpush3.bf16.msra.mxu1 %v1842_v12  ;;  %1867 = vmatpush3.bf16.msra.mxu0 %v1866_v30  ;;  %v681_v59 = vmul.f32 %v652_v43, %v616_v20  ;;  %v1894_v33 = vpack.c.bf16 %v914_v29, %v913_v34  ;;  %v915_v36 = vld [vmem:[%s2830_s4 + $0x430] sm:$0xff]  ;;  %v933_v49 = vld [vmem:[%s2830_s4 + $0x4c0] sm:$0xff]  ;;  %v934_v42 = vld [vmem:[%s2830_s4 + $0x4c8] sm:$0xff] }
 0x12e   :  { %1845 = vmatprep.subr.bf16.mxu1 %v1844_v27  ;;  %1869 = vmatprep.subr.bf16.mxu0 %v1868_v53  ;;  %v912_v27 = vld [vmem:[%s2830_s4 + $0x418] sm:$0xff]  ;;  %v775_v53 = vsel %vm755_vm7, %v745_v38, %v765_v2  ;;  %v1900_v20 = vpack.c.bf16 %v934_v42, %v933_v49  ;;  %v917_v43 = vld [vmem:[%s2830_s4 + $0x440] sm:$0xff]  ;;  %v935_v38 = vld [vmem:[%s2830_s4 + $0x4d0] sm:$0xff] }
 0x12f   :  { %v747_v22 = vadd.f32 %v718_v6, %v681_v59  ;;  %v1890_v25 = vpack.c.bf16 %v912_v27, %v911_v21  ;;  %v936_v26 = vld [vmem:[%s2830_s4 + $0x4d8] sm:$0xff]  ;;  %v939_v37 = vld [vmem:[%s2830_s4 + $0x4f0] sm:$0xff]  ;;  %v1328_v2 = vld [vmem:[%s2832_s6] sm:$0xff] }
 0x130   :  { %v1944_v48 = vpop.eup %1943  ;;  %v1904_v46 = vpack.c.bf16 %v936_v26, %v935_v38  ;;  %v940_v18 = vld [vmem:[%s2830_s4 + $0x4f8] sm:$0xff]  ;;  %v1515_v26 = vld [vmem:[%s2833_s5] ss:$0 sm:$0xff] }
 0x131   :  { %v1946_v61 = vpop.eup %1945  ;;  %v618_v50 = vmul.f32 %v1944_v48, %v2467_v9  ;;  %1847 = vmatpush3.bf16.msra.mxu1 %v1846_v31  ;;  %1871 = vmatpush3.bf16.msra.mxu0 %v1870_v32  ;;  %v909_v9 = vld [vmem:[%s2830_s4 + $0x400] sm:$0xff]  ;;  %v767_v51 = vmul.f32 0.1, %v747_v22  ;;  %v931_v31 = vld [vmem:[%s2830_s4 + $0x4b0] sm:$0xff]  ;;  %v932_v32 = vld [vmem:[%s2830_s4 + $0x4b8] sm:$0xff]  ;;  %vm757_vm9 = vcmp.gt.f32.partialorder %v747_v22, 0.0 }
 0x132   :  { %v619_v47 = vmul.f32 %v1946_v61, %v2471_v19  ;;  %1849 = vmatprep.subr.bf16.mxu1 %v1848_v39  ;;  %1873 = vmatprep.subr.bf16.mxu0 %v1872_v41  ;;  %v908_v19 = vld [vmem:[%s2830_s4 + $0x3f8] sm:$0xff]  ;;  %v1886_v10 = vpack.c.bf16 %v910_v58, %v909_v9  ;;  %v1896_v35 = vpack.c.bf16 %v932_v32, %v931_v31  ;;  %v919_v48 = vld [vmem:[%s2830_s4 + $0x450] sm:$0xff] }
 0x133   :  { %v683_v0 = vmul.f32 %v660_v56, %v618_v50  ;;  %v1880_v30 = vpack.c.bf16 %v908_v19, %v907_v57  ;;  %v916_v39 = vld [vmem:[%s2830_s4 + $0x438] sm:$0xff]  ;;  %v777_v41 = vsel %vm757_vm9, %v747_v22, %v767_v51  ;;  %v918_v56 = vld [vmem:[%s2830_s4 + $0x448] sm:$0xff] }
 0x134   :  { %v684_v17 = vmul.f32 %v664_v52, %v619_v47  ;;  %v1898_v54 = vpack.c.bf16 %v916_v39, %v915_v36  ;;  %v1902_v44 = vpack.c.bf16 %v918_v56, %v917_v43  ;;  %v920_v52 = vld [vmem:[%s2830_s4 + $0x458] sm:$0xff]  ;;  %v1329_v19 = vld [vmem:[%s2832_s6 + $0x8] sm:$0xff] }
 0x135   :  { %1851 = vmatpush3.bf16.msra.mxu1 %v1850_v13  ;;  %1875 = vmatpush3.bf16.msra.mxu0 %v1874_v62  ;;  %v2702_v40 = vadd.f32 %v726_v55, %v683_v0  ;;  %v938_v55 = vld [vmem:[%s2830_s4 + $0x4e8] sm:$0xff]  ;;  %v1906_v61 = vpack.c.bf16 %v920_v52, %v919_v48  ;;  %v921_v13 = vld [vmem:[%s2830_s4 + $0x460] sm:$0xff]  ;;  %v924_v9 = vld [vmem:[%s2830_s4 + $0x478] sm:$0xff]  ;;  %v1952_v0 = vmov 0.0|0.0   ;;  %v1917_v4 = vpack.c.bf16 %v1329_v19, %v1328_v2 }
 0x136   :  { %1877 = vmatprep.subr.bf16.mxu0 %v1876_v1  ;;  %1885 = vmatprep.subr.bf16.mxu1 %v1884_v14  ;;  %v750_v12 = vadd.f32 %v730_v7, %v684_v17  ;;  %v937_v7 = vld [vmem:[%s2830_s4 + $0x4e0] sm:$0xff]  ;;  %v922_v62 = vld [vmem:[%s2830_s4 + $0x468] sm:$0xff]  ;;  %v1912_v1 = vpack.c.bf16 %v940_v18, %v939_v37  ;;  %v923_v14 = vld [vmem:[%s2830_s4 + $0x470] sm:$0xff] }
 0x137   :  { %v1908_v50 = vpack.c.bf16 %v938_v55, %v937_v7  ;;  %v1910_v47 = vpack.c.bf16 %v922_v62, %v921_v13  ;;  %v1914_v58 = vpack.c.bf16 %v924_v9, %v923_v14  ;;  %v769_v57 = vmul.f32 0.1, %v2702_v40  ;;  %v1408_v52 = vld [vmem:[%s2834_s7] sm:$0xff]  ;;  %v1409_v7 = vld [vmem:[%s2834_s7 + $0x8] sm:$0xff] }
 0x138   :  { %1146 = vmatmul.mubr.f32.vlgmr.msra.gmra.mrb[4].mxu1 %v775_v53  ;;  %vm760_vm8 = vcmp.gt.f32.partialorder %v750_v12, 0.0  ;;  %v770_v15 = vmul.f32 0.1, %v750_v12  ;;  %vm759_vm10 = vcmp.gt.f32.partialorder %v2702_v40, 0.0  ;;  %v1517_v62 = vld [vmem:[%s2833_s5 + $0x2] ss:$0 sm:$0xff] }
 0x139   :  { %1879 = vmatpush3.bf16.msra.mxu0 %v1878_v8  ;;  %1887 = vmatpush3.bf16.msra.mxu1 %v1886_v10  ;;  %v779_v59 = vsel %vm759_vm10, %v2702_v40, %v769_v57 }
 0x13a   :  { %v780_v45 = vsel %vm760_vm8, %v750_v12, %v770_v15  ;;  %1881 = vmatprep.subr.bf16.mxu0 %v1880_v30  ;;  %1889 = vmatprep.subr.bf16.mxu1 %v1888_v16 }
 0x13b   :  { %1285 = vmatprep.mubr.f32.mxu1 %v780_v45 }
 0x13d   :  { %1883 = vmatpush3.bf16.msra.mxu0 %v1882_v63  ;;  %1891 = vmatpush3.bf16.msra.mxu1 %v1890_v25 }
 0x13e   :  { %1893 = vmatprep.subr.bf16.mxu1 %v1892_v28  ;;  %1916 = vmatprep.subr.bf16.mxu0 %v1952_v0 }
 0x140   :  { %1216 = vmatmul.mubr.f32.vlgmr.msra.gmra.mrb[10].mxu0 %v777_v41 }
 0x141   :  { %1895 = vmatpush3.bf16.msra.mxu1 %v1894_v33  ;;  %1706 = vmatprep.mubr.msk.f32.mxu0 %vm1953_vm11, %v1951_v3 }
 0x142   :  { %1897 = vmatprep.subr.bf16.mxu1 %v1896_v35  ;;  %1918 = vmatpush3.bf16.msra.mxu0 %v1917_v4 }
 0x143   :  { %1919 = vmatprep.subr.bf16.mxu0 %v1952_v0 }
 0x145   :  { %1899 = vmatpush3.bf16.msra.mxu1 %v1898_v54 }
 0x146   :  { %1901 = vmatprep.subr.bf16.mxu1 %v1900_v20 }
 0x149   :  { %1903 = vmatpush3.bf16.msra.mxu1 %v1902_v44 }
 0x14a   :  { %1905 = vmatprep.subr.bf16.mxu1 %v1904_v46  ;;  %v1516_v46 = vld [vmem:[%s2833_s5 + $0x1] ss:$0 sm:$0xff] }
 0x14d   :  { %1907 = vmatpush3.bf16.msra.mxu1 %v1906_v61 }
 0x14e   :  { %1909 = vmatprep.subr.bf16.mxu1 %v1908_v50  ;;  %v1920_v50 = vpack.c.bf16 %v1409_v7, %v1408_v52 }
 0x151   :  { %1911 = vmatpush3.bf16.msra.mxu1 %v1910_v47 }
 0x152   :  { %1913 = vmatprep.subr.bf16.mxu1 %v1912_v1  ;;  %v1519_v1 = vld [vmem:[%s2833_s5 + $0x3] ss:$0 sm:$0xff] }
 0x155   :  { %1915 = vmatpush3.bf16.msra.mxu1 %v1914_v58 }
 0x158   :  { %1286 = vmatmul.mubr.f32.vlgmr.msra.gmra.mrb[6].mxu1 %v779_v59  ;;  %v1488_v59 = vld [vmem:[%s2835_s1] sm:$0xff] }
 0x1eb   :  { %v1553_v5 = vpop.f32.mrb[2].mxu1 }
 0x1ec   :  { %v1554_v6 = vpop.f32.mrb[3].mxu1 }
 0x1ed   :  { %v1555_v17 = vadd.f32 %v1554_v6, %v1553_v5 }
 0x1f3   :  { %v1588_v8 = vpop.f32.mrb[8].mxu0 }
 0x1f4   :  { %v1589_v10 = vpop.f32.mrb[9].mxu0 }
 0x1f5   :  { %v1590_v11 = vadd.f32 %v1589_v10, %v1588_v8 }
 0x1f7   :  { %v1078_v40 = vadd.f32 %v1590_v11, %v1555_v17 }
 0x20b   :  { %v1623_v12 = vpop.f32.mrb[4].mxu1 }
 0x20c   :  { %v1624_v30 = vpop.f32.mrb[5].mxu1 }
 0x20d   :  { %v1625_v16 = vadd.f32 %v1624_v30, %v1623_v12 }
 0x20f   :  { %v1148_v24 = vadd.f32 %v1625_v16, %v1078_v40 }
 0x213   :  { %v1658_v21 = vpop.f32.mrb[10].mxu0 }
 0x214   :  { %v1659_v27 = vpop.f32.mrb[11].mxu0 }
 0x215   :  { %v1660_v53 = vadd.f32 %v1659_v27, %v1658_v21 }
 0x217   :  { %v1218_v22 = vadd.f32 %v1660_v53, %v1148_v24 }
 0x22b   :  { %v1693_v60 = vpop.f32.mrb[6].mxu1 }
 0x22c   :  { %v1694_v23 = vpop.f32.mrb[7].mxu1 }
 0x22d   :  { %v1695_v15 = vadd.f32 %v1694_v23, %v1693_v60 }
 0x22f   :  { %v1288_v63 = vadd.f32 %v1695_v15, %v1218_v22 }
 0x231   :  { %v1292_v25 = vsel %vm1291_vm12, %v1288_v63, 0.0 }
 0x232   :  { %v1293_v45 = vrot.slane %v1292_v25, 4 }
 0x234   :  { %v1294_v28 = vadd.f32 %v1293_v45, %v1292_v25 }
 0x236   :  { %v1295_v34 = vrot.slane %v1294_v28, 2 }
 0x238   :  { %v1296_v29 = vadd.f32 %v1295_v34, %v1294_v28 }
 0x23a   :  { %v1297_v51 = vrot.slane %v1296_v29, 1 }
 0x23c   :  { %v1298_v31 = vadd.f32 %v1297_v51, %v1296_v29 }
 0x23e   :  { %v1299_v32 = vmul.f32 0.125, %v1298_v31 }
 0x240   :  { %v1300_v33 = vsub.f32 %v1288_v63, %v1299_v32 }
 0x242   :  { %v1301_v35 = vmul.f32 %v1300_v33, %v1300_v33 }
 0x244   :  { %v1302_v36 = vsel %vm1291_vm12, %v1301_v35, 0.0 }
 0x245   :  { %v1303_v39 = vrot.slane %v1302_v36, 4 }
 0x247   :  { %v1304_v41 = vadd.f32 %v1303_v39, %v1302_v36 }
 0x249   :  { %v1305_v49 = vrot.slane %v1304_v41, 2 }
 0x24b   :  { %v1306_v42 = vadd.f32 %v1305_v49, %v1304_v41 }
 0x24d   :  { %v1307_v54 = vrot.slane %v1306_v42, 1 }
 0x24f   :  { %v1308_v20 = vadd.f32 %v1307_v54, %v1306_v42 }
 0x251   :  { %v1309_v43 = vmul.f32 0.125, %v1308_v20 }
 0x253   :  { %v1310_v56 = vadd.f32 1e-05, %v1309_v43 }
 0x255   :  { %1947 = vrsqrt.f32 %v1310_v56 }
 0x25f   :  { %v1948_v38 = vpop.eup %1947 }
 0x260   :  { %v1312_v44 = vmul.f32 %v1948_v38, %v1300_v33 }
 0x262   :  { %v1318_v48 = vmul.f32 %v1515_v26, %v1312_v44 }
 0x264   :  { %v1324_v55 = vadd.f32 %v1516_v46, %v1318_v48 }
 0x266   :  { %vm1325_vm13 = vcmp.gt.f32.partialorder %v1324_v55, 0.0  ;;  %v1326_v61 = vmul.f32 0.1, %v1324_v55 }
 0x268   :  { %v1327_v13 = vsel %vm1325_vm13, %v1324_v55, %v1326_v61 }
 0x269   :  { %1707 = vmatmul.mubr.msk.f32.vlgmr.msra.gmra.mrb[12].mxu0 %vm1291_vm12, %v1327_v13 }
 0x26a   :  { %1921 = vmatpush3.bf16.msra.mxu0 %v1920_v50  ;;  %1713 = vmatprep.mubr.msk.f32.mxu0 %vm1953_vm11, %v1951_v3 }
 0x26d   :  { %1714 = vmatmul.mubr.msk.f32.vlgmr.msra.gmra.mrb[14].mxu0 %vm1291_vm12, %v1327_v13 }
 0x33c   :  { %v1404_v37 = vpop.f32.mrb[12].mxu0 }
 0x33d   :  { %v1405_v18 = vadd.f32 %v1517_v62, %v1404_v37  ;;  %v1708_v47 = vpop.f32.mrb[13].mxu0 }
 0x33f   :  { %1492 = vrot.lane.b32.xlu0 %v1405_v18, %s1954_s20 }
 0x340   :  { %v1481_v14 = vpop.f32.mrb[14].mxu0 }
 0x341   :  { %v1482_v9 = vadd.f32 %v1519_v1, %v1481_v14  ;;  %v1715_v58 = vpop.f32.mrb[15].mxu0 }
 0x343   :  { %v1485_v57 = vmul.f32 0.5, %v1482_v9  ;;  %1496 = vrot.lane.b32.xlu0 %v1482_v9, %s1955_s21 }
 0x345   :  { %v1486_v3 = vmul.f32 1.442695, %v1485_v57 }
 0x347   :  { %1949 = vpow2.f32 %v1486_v3 }
 0x351   :  { %v1950_v0 = vpop.eup %1949 }
 0x352   :  { %v1489_v2 = vmul.f32 %v1950_v0, %v1488_v59 }
 0x354   :  { %v1490_v19 = vadd.f32 %v1489_v2, %v1405_v18 }
 0x3b1   :  { %v1493_v4 = vpop.permute.xlu0 %1492 }
 0x3b2   :  { %v1499_v5 = vsel %vm1291_vm12, %v1490_v19, %v1493_v4 }
 0x3b5   :  { %v1497_v6 = vpop.permute.xlu0 %1496 }
 0x3b6   :  { %v1500_v17 = vsel %vm70_vm0, %v1499_v5, %v1497_v6 }
 0x3b7   :  { %1502 = vst.msk [vmem:[%s2836_s8] sm:$0xff] %vm1501_vm14, %v1500_v17 }

</bundles_post_ra>
